<compile_context>
chip_gen: v6e
topology: v6e:2x2x1
jax: 0.10.0
libtpu: 0.0.40
codegen_flags: <defaults>
</compile_context>

<pallas_src>
import jax
import jax.numpy as jnp
from jax.experimental import pallas as pl
from jax.experimental.pallas import tpu as pltpu


# ------------------------- fused (folded-CFG) kernel -------------------------
def _cfg_denoiser_kernel(im_ref,                     # SMEM (1,): image_cfg_scale
                         z_ref, ccc_ref, ccu_ref,    # (C,hwb), (Cc,hwb), (Cc,hwb)
                         wzs_ref, wccs_ref,          # scale-folded weights (Cout,C),(Cout,Cc)
                         col_ref,                    # (Cout,1): scale*(b + cproj_u + t*(cproj_c-cproj_u))
                         o_ref):                     # (Cout,hwb)
    im = im_ref[0]
    ccu = ccu_ref[...]
    # c_concat blend (VPU): ccu + im*(ccc - ccu)  == the whole image-CFG branch, folded
    blend = ccu + im * (ccc_ref[...] - ccu)

    # 1x1-conv as lane-dense matmuls; sigma scale is pre-folded into wzs/wccs/col.
    h = (jnp.dot(wzs_ref[...], z_ref[...], preferred_element_type=jnp.float32)
         + jnp.dot(wccs_ref[...], blend, preferred_element_type=jnp.float32))
    o_ref[...] = (h + col_ref[...]).astype(o_ref.dtype)


def _pick_hw_block(hw, stream_bytes_per_lane,
                   vmem_budget_bytes=16 << 20, min_grid=4, min_tile=1024):
    """Largest lane tile that (a) divides HW (or is the whole axis), (b) keeps the
    double-buffered streamed working set under the VMEM budget (v7x-safe), and
    (c) leaves >= min_grid steps at real latent sizes so both v7x TCs get >= 2 steps."""
    if hw % 128 != 0:
        # (8,128) rule: a non-128-multiple lane axis must be one full-axis block.
        # Real latent H*W is always a multiple of 128; this path is toy/awkward sizes only.
        return hw
    cap = (vmem_budget_bytes // max(stream_bytes_per_lane, 1)) // 128 * 128
    cap = max(cap, 128)
    if hw >= min_grid * min_tile:
        cap = min(cap, max(128, (hw // min_grid) // 128 * 128))
    blk = min(cap, hw)
    blk -= blk % 128
    while blk > 128 and hw % blk != 0:
        blk -= 128
    return blk                       # >= 128 and always divides hw (hw % 128 == 0)


def cfg_denoiser_pallas(z2, ccc, ccu, wzs, wccs, col, im_scale):
    C, HW = z2.shape
    Cc = ccc.shape[0]
    Cout = wzs.shape[0]

    itemsize = jnp.dtype(z2.dtype).itemsize
    # streamed + double-buffered bytes per lane per step: z + ccc + ccu + out
    stream_bytes = (C + 2 * Cc + Cout) * itemsize * 2
    hwb = _pick_hw_block(HW, stream_bytes)
    grid = (HW // hwb,)

    return pl.pallas_call(
        _cfg_denoiser_kernel,
        out_shape=jax.ShapeDtypeStruct((Cout, HW), jnp.float32),
        grid=grid,
        in_specs=[
            pl.BlockSpec(memory_space=pltpu.MemorySpace.SMEM),   # image_cfg_scale (1,)
            pl.BlockSpec((C, hwb), lambda i: (0, i)),            # z (tiled on HW)
            pl.BlockSpec((Cc, hwb), lambda i: (0, i)),           # cond c_concat
            pl.BlockSpec((Cc, hwb), lambda i: (0, i)),           # uncond c_concat
            pl.BlockSpec((Cout, C), lambda i: (0, 0)),           # scale-folded Wz (resident)
            pl.BlockSpec((Cout, Cc), lambda i: (0, 0)),          # scale-folded Wcc (resident)
            pl.BlockSpec((Cout, 1), lambda i: (0, 0)),           # folded bias/cross-attn/scale col
        ],
        out_specs=pl.BlockSpec((Cout, hwb), lambda i: (0, i)),
        compiler_params=pltpu.CompilerParams(
            dimension_semantics=("parallel",),                   # megacore split on v7x
            vmem_limit_bytes=32 << 20),                          # explicit v7x-safe scoped limit
    )(im_scale, z2, ccc, ccu, wzs, wccs, col)


# ------------------------- CFGDenoiser wrapper -------------------------
class CFGDenoiserPallas:
    def __init__(self, params):
        # params = (w1, b1, wc) of the synthetic inner model
        # w1: (Cin, Cout) with Cin = C_z + C_concat ; b1: (1, Cout) ; wc: (Dctx, Cout)
        self.w1, self.b1, self.wc = params

    def __call__(self, z, sigma, cond, uncond, text_cfg_scale, image_cfg_scale):
        B, C, H, W = z.shape                          # B == 1 per module spec ('1 ... -> n ...')
        HW = H * W

        cc_cond = cond['c_concat'][0]                 # (1, Cc, H, W)
        cc_uncond = uncond['c_concat'][0]
        ca_cond = cond['c_crossattn'][0]              # (1, S, Dctx)
        ca_uncond = uncond['c_crossattn'][0]
        Cc = cc_cond.shape[1]
        Cout = self.w1.shape[1]

        # channels-first lane-dense layout: free contiguous reshapes, no big transposes
        z2 = z.reshape(C, HW)
        ccc = cc_cond.reshape(Cc, HW)
        ccu = cc_uncond.reshape(Cc, HW)

        # --- grid-invariant tiny work folded once per call (no per-step (Dctx,1) matmuls,
        #     no full-width sigma-scale multiply left in the kernel) ---
        scale = jax.lax.rsqrt(sigma.astype(jnp.float32)[0] ** 2 + 1.0)
        cproj_c = jnp.mean(ca_cond[0], axis=0) @ self.wc                       # (Cout,)
        cproj_u = jnp.mean(ca_uncond[0], axis=0) @ self.wc                     # (Cout,)
        col = (scale * (self.b1[0] + cproj_u
                        + text_cfg_scale * (cproj_c - cproj_u))).reshape(Cout, 1)
        wzs = scale * jnp.transpose(self.w1[:C, :])                            # (Cout, C)
        wccs = scale * jnp.transpose(self.w1[C:, :])                           # (Cout, Cc)

        im_scale = jnp.asarray([image_cfg_scale], dtype=jnp.float32)           # (1,) -> SMEM

        out = cfg_denoiser_pallas(z2, ccc, ccu, wzs, wccs, col, im_scale)      # (Cout, HW)
        return out.reshape(1, Cout, H, W)                                      # free reshape


# ------------------------- pure-JAX reference (for sanity) -------------------------
def _reference(z, sigma, cond, uncond, text_s, image_s, w1, b1, wc):
    cfg_z = jnp.concatenate([z, z, z], axis=0)
    cfg_sigma = jnp.concatenate([sigma, sigma, sigma], axis=0)
    cfg_ca = jnp.concatenate(
        [cond['c_crossattn'][0], uncond['c_crossattn'][0], uncond['c_crossattn'][0]], axis=0)
    cfg_cc = jnp.concatenate(
        [cond['c_concat'][0], cond['c_concat'][0], uncond['c_concat'][0]], axis=0)
    x = jnp.concatenate([cfg_z, cfg_cc], axis=1)
    N, Cin, H, W = x.shape
    x_npc = jnp.transpose(x, (0, 2, 3, 1)).reshape(N, H * W, Cin)
    h = x_npc @ w1 + b1
    cproj = jnp.mean(cfg_ca, axis=1) @ wc
    scale = 1.0 / jnp.sqrt(cfg_sigma ** 2 + 1.0)
    out = (h + cproj[:, None, :]) * scale[:, None, None]
    oc, oic, ou = out[0], out[1], out[2]
    comb = ou + text_s * (oc - oic) + image_s * (oic - ou)
    Cout = comb.shape[-1]
    return jnp.transpose(comb.reshape(1, H, W, Cout), (0, 3, 1, 2))


if __name__ == "__main__":
    key = jax.random.PRNGKey(0)
    kz, ks, kca, kcc, kua, kuc, kw1, kb1, kwc = jax.random.split(key, 9)

    B, C, H, W = 1, 4, 16, 16          # module spec requires batch 1 ('1 ... -> n ...')
    S, DCTX = 8, 32
    CIN = 2 * C                        # z channels + c_concat channels
    COUT = C

    z = jax.random.normal(kz, (B, C, H, W), dtype=jnp.float32)
    sigma = jax.random.uniform(ks, (B,), dtype=jnp.float32, minval=0.5, maxval=2.0)
    cond = {
        'c_crossattn': [jax.random.normal(kca, (B, S, DCTX), dtype=jnp.float32)],
        'c_concat':    [jax.random.normal(kcc, (B, C, H, W), dtype=jnp.float32)],
    }
    uncond = {
        'c_crossattn': [jax.random.normal(kua, (B, S, DCTX), dtype=jnp.float32)],
        'c_concat':    [jax.random.normal(kuc, (B, C, H, W), dtype=jnp.float32)],
    }
    text_cfg_scale = 7.5
    image_cfg_scale = 1.5

    # deterministic synthetic inner-model parameters
    w1 = jax.random.normal(kw1, (CIN, COUT), dtype=jnp.float32) * 0.1
    b1 = jax.random.normal(kb1, (1, COUT), dtype=jnp.float32) * 0.01
    wc = jax.random.normal(kwc, (DCTX, COUT), dtype=jnp.float32) * 0.1

    denoiser = CFGDenoiserPallas((w1, b1, wc))
    out = denoiser(z, sigma, cond, uncond, text_cfg_scale, image_cfg_scale)
    out = jax.block_until_ready(out)

    ref = _reference(z, sigma, cond, uncond, text_cfg_scale, image_cfg_scale, w1, b1, wc)
    assert out.shape == (1, COUT, H, W), out.shape
    assert jnp.allclose(out, ref, atol=1e-4, rtol=1e-4), float(jnp.max(jnp.abs(out - ref)))

    print("KERNEL_OK")
</pallas_src>

<mosaic_0001>
module attributes {stable_mosaic.version = 11 : i64} {
  func.func @_cfg_denoiser_kernel(%arg0: i32, %arg1: memref<1xf32, #tpu.memory_space<smem>>, %arg2: memref<4x256xf32, #tpu.memory_space<vmem>>, %arg3: memref<4x256xf32, #tpu.memory_space<vmem>>, %arg4: memref<4x256xf32, #tpu.memory_space<vmem>>, %arg5: memref<4x4xf32, #tpu.memory_space<vmem>>, %arg6: memref<4x4xf32, #tpu.memory_space<vmem>>, %arg7: memref<4x1xf32, #tpu.memory_space<vmem>>, %arg8: memref<4x256xf32, #tpu.memory_space<vmem>>) attributes {dimension_semantics = [#tpu.dimension_semantics<parallel>], iteration_bounds = array<i64: 1>, scalar_prefetch = 0 : i64, scratch_operands = 0 : i64, tpu.core_type = #tpu.core_type<tc>, window_params = [{transform_indices = @transform_0, window_bounds = array<i64: 1>}, {transform_indices = @transform_1, window_bounds = array<i64: 4, 256>}, {transform_indices = @transform_2, window_bounds = array<i64: 4, 256>}, {transform_indices = @transform_3, window_bounds = array<i64: 4, 256>}, {pipeline_mode = #tpu.pipeline_mode<synchronous>, transform_indices = @transform_4, window_bounds = array<i64: 4, 4>}, {pipeline_mode = #tpu.pipeline_mode<synchronous>, transform_indices = @transform_5, window_bounds = array<i64: 4, 4>}, {pipeline_mode = #tpu.pipeline_mode<synchronous>, transform_indices = @transform_6, window_bounds = array<i64: 4, 1>}, {transform_indices = @transform_7, window_bounds = array<i64: 4, 256>}]} {
    %c0 = arith.constant 0 : index
    %0 = memref.load %arg1[%c0] : memref<1xf32, #tpu.memory_space<smem>>
    %c0_0 = arith.constant 0 : index
    %c0_1 = arith.constant 0 : index
    %1 = vector.load %arg4[%c0_0, %c0_1] : memref<4x256xf32, #tpu.memory_space<vmem>>, vector<4x256xf32>
    %c0_2 = arith.constant 0 : index
    %c0_3 = arith.constant 0 : index
    %2 = vector.load %arg3[%c0_2, %c0_3] : memref<4x256xf32, #tpu.memory_space<vmem>>, vector<4x256xf32>
    %3 = arith.subf %2, %1 : vector<4x256xf32>
    %4 = vector.broadcast %0 : f32 to vector<4x256xf32>
    %5 = arith.mulf %4, %3 : vector<4x256xf32>
    %6 = arith.addf %1, %5 : vector<4x256xf32>
    %c0_4 = arith.constant 0 : index
    %c0_5 = arith.constant 0 : index
    %7 = vector.load %arg5[%c0_4, %c0_5] : memref<4x4xf32, #tpu.memory_space<vmem>>, vector<4x4xf32>
    %c0_6 = arith.constant 0 : index
    %c0_7 = arith.constant 0 : index
    %8 = vector.load %arg2[%c0_6, %c0_7] : memref<4x256xf32, #tpu.memory_space<vmem>>, vector<4x256xf32>
    %cst = arith.constant dense<0.000000e+00> : vector<4x256xf32>
    %9 = tpu.matmul %7, %8, %cst {dimension_numbers = #tpu.dot_dimension_numbers<[1], [0], [0], [1], [0, 0, 1, 1], [], []>} : vector<4x4xf32>, vector<4x256xf32>, vector<4x256xf32> -> vector<4x256xf32>
    %c0_8 = arith.constant 0 : index
    %c0_9 = arith.constant 0 : index
    %10 = vector.load %arg6[%c0_8, %c0_9] : memref<4x4xf32, #tpu.memory_space<vmem>>, vector<4x4xf32>
    %cst_10 = arith.constant dense<0.000000e+00> : vector<4x256xf32>
    %11 = tpu.matmul %10, %6, %cst_10 {dimension_numbers = #tpu.dot_dimension_numbers<[1], [0], [0], [1], [0, 0, 1, 1], [], []>} : vector<4x4xf32>, vector<4x256xf32>, vector<4x256xf32> -> vector<4x256xf32>
    %12 = arith.addf %9, %11 : vector<4x256xf32>
    %c0_11 = arith.constant 0 : index
    %c0_12 = arith.constant 0 : index
    %13 = vector.load %arg7[%c0_11, %c0_12] : memref<4x1xf32, #tpu.memory_space<vmem>>, vector<4x1xf32>
    %14 = vector.broadcast %13 : vector<4x1xf32> to vector<4x256xf32>
    %15 = arith.addf %12, %14 : vector<4x256xf32>
    %c0_13 = arith.constant 0 : index
    %c0_14 = arith.constant 0 : index
    %16 = vector.load %arg8[%c0_13, %c0_14] : memref<4x256xf32, #tpu.memory_space<vmem>>, vector<4x256xf32>
    tpu.vector_store %arg8[%c0_13, %c0_14], %15 {strides = array<i32>} : memref<4x256xf32, #tpu.memory_space<vmem>>, vector<4x256xf32>,
    return
  }
  func.func @transform_0(%arg0: i32) -> i32 {
    %c0_i32 = arith.constant 0 : i32
    %c0_i32_0 = arith.constant 0 : i32
    return %c0_i32 : i32
  }
  func.func @transform_1(%arg0: i32) -> (i32, i32) {
    %c0_i32 = arith.constant 0 : i32
    %c0_i32_0 = arith.constant 0 : i32
    return %c0_i32, %arg0 : i32, i32
  }
  func.func @transform_2(%arg0: i32) -> (i32, i32) {
    %c0_i32 = arith.constant 0 : i32
    %c0_i32_0 = arith.constant 0 : i32
    return %c0_i32, %arg0 : i32, i32
  }
  func.func @transform_3(%arg0: i32) -> (i32, i32) {
    %c0_i32 = arith.constant 0 : i32
    %c0_i32_0 = arith.constant 0 : i32
    return %c0_i32, %arg0 : i32, i32
  }
  func.func @transform_4(%arg0: i32) -> (i32, i32) {
    %c0_i32 = arith.constant 0 : i32
    %c0_i32_0 = arith.constant 0 : i32
    %c0_i32_1 = arith.constant 0 : i32
    return %c0_i32, %c0_i32_0 : i32, i32
  }
  func.func @transform_5(%arg0: i32) -> (i32, i32) {
    %c0_i32 = arith.constant 0 : i32
    %c0_i32_0 = arith.constant 0 : i32
    %c0_i32_1 = arith.constant 0 : i32
    return %c0_i32, %c0_i32_0 : i32, i32
  }
  func.func @transform_6(%arg0: i32) -> (i32, i32) {
    %c0_i32 = arith.constant 0 : i32
    %c0_i32_0 = arith.constant 0 : i32
    %c0_i32_1 = arith.constant 0 : i32
    return %c0_i32, %c0_i32_0 : i32, i32
  }
  func.func @transform_7(%arg0: i32) -> (i32, i32) {
    %c0_i32 = arith.constant 0 : i32
    %c0_i32_0 = arith.constant 0 : i32
    return %c0_i32, %arg0 : i32, i32
  }
}

</mosaic_0001>

<bundles_post_ra>
// kernel: tpu_custom_call.1
= control target key start
LH: loop header
LB: loop body
LE: loop exit
PB: predicated region body
PF: predicated region fallthrough
CT: control target
= control target key end

     0   :  { %13 = vsyncpa [#allocation4], 0  ;;  %s438_s0 = inlined_call_operand.<no memory space> [shape: f32[1], index: 0, kind: input, shape index: {}]   ;;  %s439_s1 = inlined_call_operand.hbm [shape: f32[4,256], index: 1, kind: input, shape index: {}]   ;;  %s440_s2 = inlined_call_operand.vmem [shape: f32[4,256], index: 2, kind: input, shape index: {}]   ;;  %s441_s3 = inlined_call_operand.hbm [shape: f32[4,256], index: 3, kind: input, shape index: {}]   ;;  %s442_s4 = inlined_call_operand.vmem [shape: f32[4,4], index: 4, kind: input, shape index: {}]   ;;  %s443_s5 = inlined_call_operand.hbm [shape: f32[4,4], index: 5, kind: input, shape index: {}]   ;;  %s444_s6 = inlined_call_operand.vmem [shape: f32[4,1], index: 6, kind: input, shape index: {}]   ;;  %s445_s7 = inlined_call_operand.hbm [shape: f32[4,256], index: 7, kind: output, shape index: {}]  }
   0x1   :  { %14 = vsyncpa [#allocation7], 0 }
   0x2   :  { %15 = vsyncpa [#allocation5], 0  ;;  %s364_s24 = smov [#allocation6]   ;;  %s365_s26 = smov [#allocation3]  }
   0x3   :  { %s36_s25 = sshll.u32 %s364_s24, 4  ;;  %s24_s27 = sshll.u32 %s365_s26, 4  ;;  %s37_s25 = int_to_ptr.vmem [resolvable:$true] %s36_s25  ;;  %s25_s27 = int_to_ptr.vmem [resolvable:$true] %s24_s27 }
   0x4   :  { %s286_s28 = scalar_lea.vmem %s37_s25, 128  ;;  %p291_p1 = scmp.lt.s32.totalorder %s37_s25, %s37_s25 }
   0x5   :  { %p287_p0 = scmp.ne.s32.totalorder %s37_s25, %s286_s28  ;;  %p292_p2 = scmp.lt.s32.totalorder %s286_s28, %s286_s28 }
   0x7   :  { %p293_p3 = por %p292_p2, %p291_p1 }
   0x9   :  { %p294_p4 = pnand %p293_p3, %p287_p0 }
   0xb   :  { %297 = shalt.err (!%p294_p4)
}
   0xc   :  { %39 = dma.hbm_to_vmem [thread:$0]  %s441_s3, 128, %s37_s25, [#allocation7]  }
   0xd   :  { %s306_s8 = scalar_lea.vmem %s25_s27, 128  ;;  %p311_p6 = scmp.lt.s32.totalorder %s25_s27, %s25_s27 }
   0xe   :  { %p307_p5 = scmp.ne.s32.totalorder %s25_s27, %s306_s8  ;;  %p312_p7 = scmp.lt.s32.totalorder %s306_s8, %s306_s8 }
  0x10   :  { %p313_p8 = por %p312_p7, %p311_p6 }
  0x12   :  { %p314_p9 = pnand %p313_p8, %p307_p5 }
  0x14   :  { %317 = shalt.err (!%p314_p9)
}
  0x15   :  { %27 = dma.hbm_to_vmem [thread:$0]  %s439_s1, 128, %s25_s27, [#allocation4]  }
  0x16   :  { %s366_s11 = smov [#allocation8]  }
  0x17   :  { %s48_s12 = sshll.u32 %s366_s11, 4  ;;  %s49_s12 = int_to_ptr.vmem [resolvable:$true] %s48_s12 }
  0x18   :  { %s326_s13 = scalar_lea.vmem %s49_s12, 64  ;;  %p331_p11 = scmp.lt.s32.totalorder %s49_s12, %s49_s12 }
  0x19   :  { %p327_p10 = scmp.ne.s32.totalorder %s49_s12, %s326_s13  ;;  %p332_p12 = scmp.lt.s32.totalorder %s326_s13, %s326_s13 }
  0x1b   :  { %p333_p13 = por %p332_p12, %p331_p11 }
  0x1d   :  { %p334_p0 = pnand %p333_p13, %p327_p10 }
  0x1f   :  { %337 = shalt.err (!%p334_p0)
}
  0x20   :  { %51 = dma.hbm_to_vmem [thread:$0]  %s443_s5, 64, %s49_s12, [#allocation7]  }
  0x21   :  { %358 = dma.done.wait [#allocation4], 128  }
  0x22   :  { %359 = vsyncadd [#allocation4], 4294967168 }
  0x23   :  { %360 = dma.done.wait [#allocation7], 192  }
  0x24   :  { %361 = vsyncadd [#allocation7], 4294967104  ;;  %v367_v0 = vmov 0.0   ;;  %v368_v1 = vmov 0   ;;  %v71_v2 = vld [vmem:[#allocation3] sm:$0xff]  ;;  %vm79_vm0 = vcmask 1043456   ;;  %v67_v5 = vstv %s438_s0 }
  0x25   :  { %228 = vmatprep.mubr.f32.mxu1 %v367_v0  ;;  %148 = vmatprep.mubr.f32.mxu0 %v367_v0  ;;  %v64_v3 = vld [vmem:[#allocation6] sm:$0xff]  ;;  %v65_v4 = vld [vmem:[%s440_s2] sm:$0xff]  ;;  %v156_v6 = vcombine.high %v71_v2, %v71_v2  ;;  %vm75_vm1 = vcmask 31744   ;;  %v72_v13 = vld [vmem:[#allocation8] sm:$0xf]  ;;  %s369_s0 = smov [#allocation9]  }
  0x26   :  { %276 = vset.pattern.permute.xlu0 %v368_v1  ;;  %v66_v7 = vsub.f32 %v65_v4, %v64_v3  ;;  %v235_v8 = vld [vmem:[%s444_s6] sm:$0xf]  ;;  %s254_s2 = sshll.u32 %s369_s0, 4  ;;  %s255_s2 = int_to_ptr.vmem [resolvable:$true] %s254_s2 }
  0x27   :  { %v70_v9 = vld [vmem:[%s442_s4] sm:$0xf]  ;;  %238 = vperm.xlu0 %276, %v235_v8   ;;  %267 = vmatprep.subr.msk.mxu1 %vm79_vm0, %v156_v6  ;;  %s338_s4 = scalar_lea.vmem %s255_s2, 128  ;;  %p343_p2 = scmp.lt.s32.totalorder %s255_s2, %s255_s2 }
  0x28   :  { %v68_v10 = vmul.f32 %v67_v5, %v66_v7  ;;  %268 = vmatpush1.msk.msra.mxu1 %vm79_vm0, %v71_v2  ;;  %p339_p1 = scmp.ne.s32.totalorder %s255_s2, %s338_s4  ;;  %p344_p3 = scmp.lt.s32.totalorder %s338_s4, %s338_s4 }
  0x29   :  { %269 = vmatmul.mubr.msk.f32.vlgmr.msra.gmra.mxu1 %vm75_vm1, %v70_v9 }
  0x2a   :  { %v69_v11 = vadd.f32 %v68_v10, %v64_v3  ;;  %p345_p4 = por %p344_p3, %p343_p2 }
  0x2c   :  { %v74_v12 = vcombine.high %v69_v11, %v69_v11  ;;  %p346_p5 = pnand %p345_p4, %p339_p1 }
  0x2e   :  { %264 = vmatprep.subr.msk.mxu0 %vm79_vm0, %v74_v12 }
  0x2f   :  { %265 = vmatpush1.msk.msra.mxu0 %vm79_vm0, %v69_v11 }
  0x30   :  { %266 = vmatmul.mubr.msk.f32.vlgmr.msra.gmra.mxu0 %vm75_vm1, %v72_v13 }
  0xa2   :  { %v239_v17 = vpop.permute.xlu0 %238 }
  0xe9   :  { %v230_v14 = vpop.f32.mrf.mxu1 }
  0xeb   :  { %v232_v18 = vpop.f32.mrf.mxu1 }
  0xf0   :  { %v150_v15 = vpop.f32.mrf.mxu0 }
  0xf1   :  { %v231_v16 = vadd.f32 %v230_v14, %v150_v15 }
  0xf2   :  { %v152_v19 = vpop.f32.mrf.mxu0 }
  0xf3   :  { %v233_v20 = vadd.f32 %v232_v18, %v152_v19  ;;  %v241_v21 = vadd.f32 %v239_v17, %v231_v16 }
  0xf5   :  { %v242_v22 = vadd.f32 %v239_v17, %v233_v20 }
  0xf7   :  { %v245_v23 = vcombine.low %v241_v21, %v242_v22 }
  0xf9   :  { %247 = vst [vmem:[#allocation9] sm:$0xff] %v245_v23 }
  0xfa   :  { %349 = shalt.err (!%p346_p5)
}
  0xfb   :  { %257 = dma.vmem_to_hbm [thread:$0]  %s255_s2, 128, %s445_s7, [#allocation5]  }
  0xfc   :  { %362 = dma.done.wait [#allocation5], 128  }
  0xfd   :  { %363 = vsyncadd [#allocation5], 4294967168 }
  0xfe   :  { %261 = vsyncpa [#allocation4], 1 }
  0xff   :  { %262 = vsyncpa [#allocation7], 1 }
 0x100   :  { %263 = vsyncpa [#allocation5], 1 }

</bundles_post_ra>
